<compile_context>
chip_gen: v5e
topology: v5e:2x2
jax: 0.10.0
libtpu: 0.0.40
codegen_flags: <defaults>
</compile_context>

<pallas_src>
import jax
import jax.numpy as jnp
from jax import lax
from jax.experimental import pallas as pl
from jax.experimental.pallas import tpu as pltpu

EPS = 1e-12
POWER_ITERATIONS = 1


# -----------------------------------------------------------------------------
# Kernel 1: power iteration -> sigma, updated u/v, and the spectrally-normalised
# bf16 weight taps (scale + cast fused here so no XLA glue sits between the two
# pallas_calls on the critical path).  Conv weights are tiny, so one block.
# -----------------------------------------------------------------------------
def _spectral_sigma_kernel(w_ref, wrows_ref, u_ref, v_ref,
                           sigma_ref, u_out_ref, v_out_ref, wsn_ref):
    w = w_ref[...]        # (OC, K)            f32
    u = u_ref[...]        # (1, OC)            f32
    v = v_ref[...]        # (1, K)             f32  (used as-is if 0 iterations)

    for _ in range(POWER_ITERATIONS):
        wv = jnp.dot(u, w, preferred_element_type=jnp.float32)                # (1, K)
        v = wv * lax.rsqrt(jnp.sum(wv * wv, keepdims=True) + EPS * EPS)       # EUP
        wu = lax.dot_general(v, w, (((1,), (1,)), ((), ())),
                             preferred_element_type=jnp.float32)              # (1, OC)
        u = wu * lax.rsqrt(jnp.sum(wu * wu, keepdims=True) + EPS * EPS)

    wv2 = lax.dot_general(w, v, (((1,), (1,)), ((), ())),
                          preferred_element_type=jnp.float32)                 # (OC, 1)
    sigma = jnp.dot(u, wv2, preferred_element_type=jnp.float32)               # (1, 1)

    sigma_ref[...] = sigma
    u_out_ref[...] = u
    v_out_ref[...] = v
    inv_sigma = 1.0 / sigma                                                   # (1, 1)
    # tap-major rows of (weight / sigma), cast to bf16 for the conv kernel
    wsn_ref[...] = (wrows_ref[...] * inv_sigma).astype(jnp.bfloat16)


def spectral_sigma(w_mat, w_rows, u, v):
    """w_mat: (OC, K) f32, w_rows: (KH*KW*OC, C) f32, u: (1, OC), v: (1, K)."""
    OC, K = w_mat.shape
    R, C = w_rows.shape
    return pl.pallas_call(
        _spectral_sigma_kernel,
        out_shape=(
            jax.ShapeDtypeStruct((1, 1), jnp.float32),
            jax.ShapeDtypeStruct((1, OC), jnp.float32),
            jax.ShapeDtypeStruct((1, K), jnp.float32),
            jax.ShapeDtypeStruct((R, C), jnp.bfloat16),
        ),
        grid_spec=pltpu.PrefetchScalarGridSpec(
            num_scalar_prefetch=0,
            grid=(1,),
            in_specs=[
                pl.BlockSpec((OC, K), lambda i: (0, 0)),
                pl.BlockSpec((R, C), lambda i: (0, 0)),
                pl.BlockSpec((1, OC), lambda i: (0, 0)),
                pl.BlockSpec((1, K), lambda i: (0, 0)),
            ],
            out_specs=[
                pl.BlockSpec((1, 1), lambda i: (0, 0)),
                pl.BlockSpec((1, OC), lambda i: (0, 0)),
                pl.BlockSpec((1, K), lambda i: (0, 0)),
                pl.BlockSpec((R, C), lambda i: (0, 0)),
            ],
        ),
    )(w_mat, w_rows, u, v)


# -----------------------------------------------------------------------------
# Kernel 2: fused spectrally-normalised conv (stride 1, SAME padding).
# -----------------------------------------------------------------------------
def _choose_row_tile(H, W, OC, out_bytes):
    """Largest row tile TH with TH | H and a lane-dense (OC, TH*W) output block,
    sized so the f32 accumulator and the double-buffered output block stay small
    (OC-aware), or the full image if it already fits."""
    max_lanes = max(128, min((128 * 1024) // (4 * OC),              # f32 acc ~128 KiB
                             (4 * 1024 * 1024) // (2 * out_bytes * OC)))
    if H * W <= max_lanes:
        return H
    for th in range(H, 0, -1):
        if H % th == 0 and th * W <= max_lanes and (th * W) % 128 == 0:
            return th
    # TODO(synk): pad H*W up to a multiple of 128 with a cropped last tile
    # (grid = pl.cdiv) instead of one full-image tile for awkward (H, W).
    return H


def _make_conv_kernel(C, OC, H, W, KH, KW, TH, out_dtype):
    THW = TH * W
    WIN = (TH + KH - 1) * W + (KW - 1)   # flat window needed per row tile
    PAD_W = KW // 2
    T = H // TH
    if T > 1:
        # the pl.multiple_of hint below relies on lane-dense tiles
        assert THW % 128 == 0, "tiled path requires TH*W to be a multiple of 128"

    def kernel(xf_ref, w_ref, b_ref, m_ref, out_ref):
        # xf_ref : (1, C, L)        bf16  flattened zero-padded image of batch n
        # w_ref  : (KH*KW, OC, C)   bf16  spectrally-normalised taps (w / sigma)
        # b_ref  : (OC, 1)          f32
        # m_ref  : (KW, 1, TH*W)    bf16  0/1 column-validity masks per horiz. tap
        # out_ref: (1, OC, TH*W)    out_dtype
        if T == 1:
            win = xf_ref[0, :, :]                                   # (C, L)
        else:
            start = pl.multiple_of(pl.program_id(1) * THW, 128)
            win = xf_ref[0, :, pl.ds(start, WIN)]                   # (C, WIN)

        # bias folded into the accumulator init (hoisted broadcast, once/tile)
        acc = jnp.broadcast_to(b_ref[...], (OC, THW))               # f32
        for dj in range(KW):
            m = m_ref[dj] if dj != PAD_W else None                  # (1, THW) bf16
            for di in range(KH):
                off = di * W + dj
                xs = win[:, off:off + THW]                          # (C, THW) bf16
                if m is not None:
                    # Horizontal taps that step outside the image read wrapped
                    # pixels in the flattened layout; exact 0/1 bf16 mask on the
                    # small input side (no (OC, THW) f32 masking, no `part`).
                    xs = xs * m
                acc = acc + jnp.dot(w_ref[di * KW + dj], xs,
                                    preferred_element_type=jnp.float32)
        out_ref[0, :, :] = acc.astype(out_dtype)

    return kernel


def spectral_norm_conv2d_forward(x, weight, bias, u, v, out_dtype=jnp.float32):
    """SpectralNorm(Conv2d).forward.

    x: (N, C, H, W) f32 NCHW; weight: (OC, C, KH, KW); bias: (OC,);
    u: (OC,), v: (C*KH*KW,) power-iteration buffers.
    Returns (out NCHW, sigma (1, 1), u_new (OC,), v_new (C*KH*KW,)).
    """
    N, C, H, W = x.shape
    OC, IC, KH, KW = weight.shape
    if IC != C:
        raise ValueError("channel mismatch between x and weight")
    if KH % 2 != 1 or KW % 2 != 1:
        # the wrap-mask scheme assumes stride 1 / padding = k // 2 (odd kernels),
        # matching the Conv2d usage wrapped by SpectralNorm in networks.py
        raise NotImplementedError("only stride-1 SAME conv with odd kernels")
    K = C * KH * KW
    pad_h, pad_w = KH // 2, KW // 2

    # --- power iteration + weight scaling (f32 iteration, bf16 scaled taps) ---
    w_f32 = weight.astype(jnp.float32)
    w_mat = w_f32.reshape(OC, K)
    # tap-major rows: row (di*KW + dj)*OC + oc holds weight[oc, :, di, dj]
    w_rows = jnp.transpose(w_f32, (2, 3, 0, 1)).reshape(KH * KW * OC, C)
    sigma, u_new, v_new, w_rows_sn = spectral_sigma(
        w_mat, w_rows,
        u.reshape(1, OC).astype(jnp.float32),
        v.reshape(1, K).astype(jnp.float32))
    w_taps = w_rows_sn.reshape(KH * KW, OC, C)        # free leading-dim reshape

    # --- flatten spatial dims + zero pad so each tap is a contiguous slice ----
    off_pad = pad_h * W + pad_w
    xf = jnp.pad(x.reshape(N, C, H * W).astype(jnp.bfloat16),
                 ((0, 0), (0, 0), (off_pad, off_pad)))              # (N, C, L)
    L = xf.shape[-1]

    out_bytes = jnp.dtype(out_dtype).itemsize
    TH = _choose_row_tile(H, W, OC, out_bytes)
    T = H // TH
    THW = TH * W

    # Precomputed 0/1 column-validity masks (bf16) for the horizontal taps.
    col = jnp.arange(THW, dtype=jnp.int32) % W
    col_masks = jnp.stack(
        [((col + (dj - pad_w) >= 0) & (col + (dj - pad_w) < W)) for dj in range(KW)]
    ).astype(jnp.bfloat16).reshape(KW, 1, THW)

    bias_col = bias.reshape(OC, 1).astype(jnp.float32)

    # VMEM limit sized from the actual block footprint (grows up to 96 MiB on
    # v5e/v6e for large shapes; stays at the safe 32 MiB default for small ones).
    vmem_need = (2 * C * L * 2                       # double-buffered bf16 slab
                 + 2 * OC * THW * out_bytes          # double-buffered output block
                 + 2 * (KH * KW * OC * C * 2 + KW * THW * 2 + OC * 4)
                 + (2 << 20))                        # headroom
    vmem_limit = int(min(96 * 1024 * 1024, max(32 * 1024 * 1024, vmem_need)))

    cost = pl.CostEstimate(
        flops=2 * N * OC * C * KH * KW * H * W,
        transcendentals=0,
        bytes_accessed=int(N * C * L * 2 + KH * KW * OC * C * 2
                           + KW * THW * 2 + OC * 4
                           + N * OC * H * W * out_bytes))

    out_flat = pl.pallas_call(
        _make_conv_kernel(C, OC, H, W, KH, KW, TH, out_dtype),
        out_shape=jax.ShapeDtypeStruct((N, OC, H * W), out_dtype),
        grid_spec=pltpu.PrefetchScalarGridSpec(
            num_scalar_prefetch=0,
            grid=(N, T),
            in_specs=[
                pl.BlockSpec((1, C, L), lambda n, t: (n, 0, 0)),
                pl.BlockSpec((KH * KW, OC, C), lambda n, t: (0, 0, 0)),
                pl.BlockSpec((OC, 1), lambda n, t: (0, 0)),
                pl.BlockSpec((KW, 1, THW), lambda n, t: (0, 0, 0)),
            ],
            out_specs=pl.BlockSpec((1, OC, THW), lambda n, t: (n, 0, t)),
        ),
        compiler_params=pltpu.CompilerParams(
            # only shard the image axis across v7x's 2 TCs so the per-image
            # slab is not DMA'd twice; t stays a sequential loop
            dimension_semantics=("parallel", "arbitrary"),
            vmem_limit_bytes=vmem_limit),
        cost_estimate=cost,
    )(xf, w_taps, bias_col, col_masks)

    out = out_flat.reshape(N, OC, H, W)        # NCHW, no transpose needed
    return out, sigma, u_new.reshape(OC), v_new.reshape(K)


# -----------------------------------------------------------------------------
# Pure-JAX reference for validation
# -----------------------------------------------------------------------------
def _l2normalize(x, eps=EPS):
    return x / (jnp.linalg.norm(x) + eps)


def reference_forward(x, weight, bias, u, v, bf16_conv=False):
    OC = weight.shape[0]
    w_mat = weight.reshape(OC, -1)
    uu, vv = u, v
    for _ in range(POWER_ITERATIONS):
        vv = _l2normalize(w_mat.T @ uu)
        uu = _l2normalize(w_mat @ vv)
    sigma = uu @ (w_mat @ vv)
    w_sn = weight / sigma
    xc = x
    if bf16_conv:  # mirror the kernel's bf16 operand rounding (f32 accumulation)
        w_sn = w_sn.astype(jnp.bfloat16).astype(jnp.float32)
        xc = x.astype(jnp.bfloat16).astype(jnp.float32)
    y = lax.conv_general_dilated(
        xc, w_sn, window_strides=(1, 1), padding="SAME",
        dimension_numbers=("NCHW", "OIHW", "NCHW"))
    return y + bias.reshape(1, OC, 1, 1), sigma, uu, vv


if __name__ == "__main__":
    key = jax.random.PRNGKey(0)
    k_x, k_w, k_b, k_u, k_v = jax.random.split(key, 5)

    # Wrapped module: nn.Conv2d(in_channels=4, out_channels=8, kernel=3, padding=1)
    N, C, H, W = 2, 4, 16, 16
    OC, KH, KW = 8, 3, 3

    x = jax.random.normal(k_x, (N, C, H, W), dtype=jnp.float32)
    weight = jax.random.normal(k_w, (OC, C, KH, KW), dtype=jnp.float32) * 0.1
    bias = jax.random.normal(k_b, (OC,), dtype=jnp.float32) * 0.1
    # u, v buffers: normal(0,1), l2-normalised, as in SpectralNorm._make_params
    u0 = _l2normalize(jax.random.normal(k_u, (OC,), dtype=jnp.float32))
    v0 = _l2normalize(jax.random.normal(k_v, (C * KH * KW,), dtype=jnp.float32))

    out, sigma, u_new, v_new = spectral_norm_conv2d_forward(x, weight, bias, u0, v0)
    out = jax.block_until_ready(out)

    ref_f32, ref_sigma, ref_u, ref_v = reference_forward(
        x, weight, bias, u0, v0, bf16_conv=False)
    ref_bf16, _, _, _ = reference_forward(x, weight, bias, u0, v0, bf16_conv=True)

    assert jnp.allclose(sigma[0, 0], ref_sigma, rtol=1e-5, atol=1e-5), (sigma, ref_sigma)
    assert jnp.allclose(u_new, ref_u, rtol=1e-4, atol=1e-4)
    assert jnp.allclose(v_new, ref_v, rtol=1e-4, atol=1e-4)
    # kernel vs. reference with identically bf16-rounded conv operands (tight)
    assert jnp.allclose(out, ref_bf16, rtol=1e-2, atol=1e-2), \
        float(jnp.max(jnp.abs(out - ref_bf16)))
    # kernel vs. exact-f32 module reference (loose: bf16 streaming drift)
    assert jnp.allclose(out, ref_f32, rtol=5e-2, atol=5e-2), \
        float(jnp.max(jnp.abs(out - ref_f32)))

    # Optional bf16 writeback path (halves the dominant output HBM stream).
    out_bf16, _, _, _ = spectral_norm_conv2d_forward(
        x, weight, bias, u0, v0, out_dtype=jnp.bfloat16)
    out_bf16 = jax.block_until_ready(out_bf16).astype(jnp.float32)
    assert jnp.allclose(out_bf16, ref_bf16, rtol=3e-2, atol=3e-2), \
        float(jnp.max(jnp.abs(out_bf16 - ref_bf16)))

    print("KERNEL_OK")
</pallas_src>

<mosaic_0001>
module attributes {stable_mosaic.version = 11 : i64} {
  func.func @_spectral_sigma_kernel(%arg0: i32, %arg1: memref<8x36xf32, #tpu.memory_space<vmem>>, %arg2: memref<72x4xf32, #tpu.memory_space<vmem>>, %arg3: memref<1x8xf32, #tpu.memory_space<vmem>>, %arg4: memref<1x36xf32, #tpu.memory_space<vmem>>, %arg5: memref<1x1xf32, #tpu.memory_space<vmem>>, %arg6: memref<1x8xf32, #tpu.memory_space<vmem>>, %arg7: memref<1x36xf32, #tpu.memory_space<vmem>>, %arg8: memref<72x4xbf16, #tpu.memory_space<vmem>>) attributes {dimension_semantics = [#tpu.dimension_semantics<arbitrary>], iteration_bounds = array<i64: 1>, scalar_prefetch = 0 : i64, scratch_operands = 0 : i64, tpu.core_type = #tpu.core_type<tc>, window_params = [{pipeline_mode = #tpu.pipeline_mode<synchronous>, transform_indices = @transform_0, window_bounds = array<i64: 8, 36>}, {pipeline_mode = #tpu.pipeline_mode<synchronous>, transform_indices = @transform_1, window_bounds = array<i64: 72, 4>}, {pipeline_mode = #tpu.pipeline_mode<synchronous>, transform_indices = @transform_2, window_bounds = array<i64: 1, 8>}, {pipeline_mode = #tpu.pipeline_mode<synchronous>, transform_indices = @transform_3, window_bounds = array<i64: 1, 36>}, {pipeline_mode = #tpu.pipeline_mode<synchronous>, transform_indices = @transform_4, window_bounds = array<i64: 1, 1>}, {pipeline_mode = #tpu.pipeline_mode<synchronous>, transform_indices = @transform_5, window_bounds = array<i64: 1, 8>}, {pipeline_mode = #tpu.pipeline_mode<synchronous>, transform_indices = @transform_6, window_bounds = array<i64: 1, 36>}, {pipeline_mode = #tpu.pipeline_mode<synchronous>, transform_indices = @transform_7, window_bounds = array<i64: 72, 4>}]} {
    %c0 = arith.constant 0 : index
    %c0_0 = arith.constant 0 : index
    %0 = vector.load %arg1[%c0, %c0_0] : memref<8x36xf32, #tpu.memory_space<vmem>>, vector<8x36xf32>
    %c0_1 = arith.constant 0 : index
    %c0_2 = arith.constant 0 : index
    %1 = vector.load %arg3[%c0_1, %c0_2] : memref<1x8xf32, #tpu.memory_space<vmem>>, vector<1x8xf32>
    %cst = arith.constant dense<0.000000e+00> : vector<1x36xf32>
    %2 = tpu.matmul %1, %0, %cst {dimension_numbers = #tpu.dot_dimension_numbers<[1], [0], [0], [1], [0, 0, 1, 1], [], []>} : vector<1x8xf32>, vector<8x36xf32>, vector<1x36xf32> -> vector<1x36xf32>
    %3 = arith.mulf %2, %2 : vector<1x36xf32>
    %4 = vector.shape_cast %3 : vector<1x36xf32> to vector<1x1x36xf32>
    %cst_3 = arith.constant dense<0.000000e+00> : vector<1xf32>
    %5 = vector.multi_reduction <add>, %4, %cst_3 [1, 2] : vector<1x1x36xf32> to vector<1xf32>
    %6 = vector.shape_cast %5 : vector<1xf32> to vector<1x1x1xf32>
    %7 = vector.extract %6[0, 0, 0] : f32 from vector<1x1x1xf32>
    %8 = vector.broadcast %7 : f32 to vector<1x1xf32>
    %cst_4 = arith.constant 1.000000e-24 : f32
    %9 = vector.broadcast %cst_4 : f32 to vector<1x1xf32>
    %10 = arith.addf %8, %9 : vector<1x1xf32>
    %11 = math.rsqrt %10 : vector<1x1xf32>
    %12 = vector.broadcast %11 : vector<1x1xf32> to vector<1x36xf32>
    %13 = arith.mulf %2, %12 : vector<1x36xf32>
    %cst_5 = arith.constant dense<0.000000e+00> : vector<1x8xf32>
    %14 = tpu.matmul %13, %0, %cst_5 {dimension_numbers = #tpu.dot_dimension_numbers<[1], [1], [0], [0], [0, 0, 1, 0], [], []>} : vector<1x36xf32>, vector<8x36xf32>, vector<1x8xf32> -> vector<1x8xf32>
    %15 = arith.mulf %14, %14 : vector<1x8xf32>
    %16 = vector.shape_cast %15 : vector<1x8xf32> to vector<1x1x8xf32>
    %cst_6 = arith.constant dense<0.000000e+00> : vector<1xf32>
    %17 = vector.multi_reduction <add>, %16, %cst_6 [1, 2] : vector<1x1x8xf32> to vector<1xf32>
    %18 = vector.shape_cast %17 : vector<1xf32> to vector<1x1x1xf32>
    %19 = vector.extract %18[0, 0, 0] : f32 from vector<1x1x1xf32>
    %20 = vector.broadcast %19 : f32 to vector<1x1xf32>
    %cst_7 = arith.constant 1.000000e-24 : f32
    %21 = vector.broadcast %cst_7 : f32 to vector<1x1xf32>
    %22 = arith.addf %20, %21 : vector<1x1xf32>
    %23 = math.rsqrt %22 : vector<1x1xf32>
    %24 = vector.broadcast %23 : vector<1x1xf32> to vector<1x8xf32>
    %25 = arith.mulf %14, %24 : vector<1x8xf32>
    %cst_8 = arith.constant dense<0.000000e+00> : vector<8x1xf32>
    %26 = tpu.matmul %0, %13, %cst_8 {dimension_numbers = #tpu.dot_dimension_numbers<[1], [1], [0], [0], [0, 0, 1, 0], [], []>} : vector<8x36xf32>, vector<1x36xf32>, vector<8x1xf32> -> vector<8x1xf32>
    %cst_9 = arith.constant dense<0.000000e+00> : vector<1x1xf32>
    %27 = tpu.matmul %25, %26, %cst_9 {dimension_numbers = #tpu.dot_dimension_numbers<[1], [0], [0], [1], [0, 0, 1, 1], [], []>} : vector<1x8xf32>, vector<8x1xf32>, vector<1x1xf32> -> vector<1x1xf32>
    %c0_10 = arith.constant 0 : index
    %c0_11 = arith.constant 0 : index
    %28 = vector.load %arg5[%c0_10, %c0_11] : memref<1x1xf32, #tpu.memory_space<vmem>>, vector<1x1xf32>
    tpu.vector_store %arg5[%c0_10, %c0_11], %27 {strides = array<i32>} : memref<1x1xf32, #tpu.memory_space<vmem>>, vector<1x1xf32>,
    %c0_12 = arith.constant 0 : index
    %c0_13 = arith.constant 0 : index
    %29 = vector.load %arg6[%c0_12, %c0_13] : memref<1x8xf32, #tpu.memory_space<vmem>>, vector<1x8xf32>
    tpu.vector_store %arg6[%c0_12, %c0_13], %25 {strides = array<i32>} : memref<1x8xf32, #tpu.memory_space<vmem>>, vector<1x8xf32>,
    %c0_14 = arith.constant 0 : index
    %c0_15 = arith.constant 0 : index
    %30 = vector.load %arg7[%c0_14, %c0_15] : memref<1x36xf32, #tpu.memory_space<vmem>>, vector<1x36xf32>
    tpu.vector_store %arg7[%c0_14, %c0_15], %13 {strides = array<i32>} : memref<1x36xf32, #tpu.memory_space<vmem>>, vector<1x36xf32>,
    %cst_16 = arith.constant 1.000000e+00 : f32
    %31 = vector.broadcast %cst_16 : f32 to vector<1x1xf32>
    %32 = arith.divf %31, %27 : vector<1x1xf32>
    %c0_17 = arith.constant 0 : index
    %c0_18 = arith.constant 0 : index
    %33 = vector.load %arg2[%c0_17, %c0_18] : memref<72x4xf32, #tpu.memory_space<vmem>>, vector<72x4xf32>
    %34 = vector.broadcast %32 : vector<1x1xf32> to vector<72x4xf32>
    %35 = arith.mulf %33, %34 : vector<72x4xf32>
    %36 = arith.truncf %35 : vector<72x4xf32> to vector<72x4xbf16>
    %c0_19 = arith.constant 0 : index
    %c0_20 = arith.constant 0 : index
    %37 = vector.load %arg8[%c0_19, %c0_20] : memref<72x4xbf16, #tpu.memory_space<vmem>>, vector<72x4xbf16>
    tpu.vector_store %arg8[%c0_19, %c0_20], %36 {strides = array<i32>} : memref<72x4xbf16, #tpu.memory_space<vmem>>, vector<72x4xbf16>,
    return
  }
  func.func @transform_0(%arg0: i32) -> (i32, i32) {
    %c0_i32 = arith.constant 0 : i32
    %c0_i32_0 = arith.constant 0 : i32
    %c0_i32_1 = arith.constant 0 : i32
    return %c0_i32, %c0_i32_0 : i32, i32
  }
  func.func @transform_1(%arg0: i32) -> (i32, i32) {
    %c0_i32 = arith.constant 0 : i32
    %c0_i32_0 = arith.constant 0 : i32
    %c0_i32_1 = arith.constant 0 : i32
    return %c0_i32, %c0_i32_0 : i32, i32
  }
  func.func @transform_2(%arg0: i32) -> (i32, i32) {
    %c0_i32 = arith.constant 0 : i32
    %c0_i32_0 = arith.constant 0 : i32
    %c0_i32_1 = arith.constant 0 : i32
    return %c0_i32, %c0_i32_0 : i32, i32
  }
  func.func @transform_3(%arg0: i32) -> (i32, i32) {
    %c0_i32 = arith.constant 0 : i32
    %c0_i32_0 = arith.constant 0 : i32
    %c0_i32_1 = arith.constant 0 : i32
    return %c0_i32, %c0_i32_0 : i32, i32
  }
  func.func @transform_4(%arg0: i32) -> (i32, i32) {
    %c0_i32 = arith.constant 0 : i32
    %c0_i32_0 = arith.constant 0 : i32
    %c0_i32_1 = arith.constant 0 : i32
    return %c0_i32, %c0_i32_0 : i32, i32
  }
  func.func @transform_5(%arg0: i32) -> (i32, i32) {
    %c0_i32 = arith.constant 0 : i32
    %c0_i32_0 = arith.constant 0 : i32
    %c0_i32_1 = arith.constant 0 : i32
    return %c0_i32, %c0_i32_0 : i32, i32
  }
  func.func @transform_6(%arg0: i32) -> (i32, i32) {
    %c0_i32 = arith.constant 0 : i32
    %c0_i32_0 = arith.constant 0 : i32
    %c0_i32_1 = arith.constant 0 : i32
    return %c0_i32, %c0_i32_0 : i32, i32
  }
  func.func @transform_7(%arg0: i32) -> (i32, i32) {
    %c0_i32 = arith.constant 0 : i32
    %c0_i32_0 = arith.constant 0 : i32
    %c0_i32_1 = arith.constant 0 : i32
    return %c0_i32, %c0_i32_0 : i32, i32
  }
}

</mosaic_0001>

<bundles_post_ra>
// kernel: tpu_custom_call.1
= control target key start
LH: loop header
LB: loop body
LE: loop exit
PB: predicated region body
PF: predicated region fallthrough
CT: control target
= control target key end

     0   :  { %13 = vsyncpa [#allocation3], 0  ;;  %vm25_vm0 = vcmask 64512   ;;  %s490_s0 = inlined_call_operand.vmem [shape: f32[8,36], index: 0, kind: input, shape index: {}]   ;;  %s491_s1 = inlined_call_operand.vmem [shape: f32[72,4], index: 1, kind: input, shape index: {}]   ;;  %s492_s2 = inlined_call_operand.vmem [shape: f32[1,8], index: 2, kind: input, shape index: {}]   ;;  %s493_s3 = inlined_call_operand.vmem [shape: f32[1,36], index: 3, kind: input, shape index: {}]   ;;  %s494_s4 = inlined_call_operand.hbm [shape: f32[1,1], index: 4, kind: output, shape index: {0}]   ;;  %s495_s5 = inlined_call_operand.hbm [shape: f32[1,8], index: 5, kind: output, shape index: {1}]   ;;  %s496_s6 = inlined_call_operand.hbm [shape: f32[1,36], index: 6, kind: output, shape index: {2}]   ;;  %s497_s7 = inlined_call_operand.vmem [shape: bf16[72,4], index: 7, kind: output, shape index: {3}]  }
   0x1   :  { %v23_v0 = vld [vmem:[%s490_s0] sm:$0xff] }
   0x2   :  { %v24_v1 = vld [vmem:[%s492_s2] sm:$0x1] }
   0x3   :  { %14 = vsyncpa [#allocation5], 0  ;;  %44 = vmatpush.msra.mxu0 %v23_v0  ;;  %vm50_vm1 = vcmask 286720   ;;  %vm74_vm2 = vcmask 293888   ;;  %vm102_vm6 = vcmask 57344   ;;  %s360_s3 = smov [#allocation4]  }
   0x4   :  { %265 = vmatmul.msk.f32.vlgmr.msra.gmra.mxu0 %vm25_vm0, %v24_v1  ;;  %266 = vmatpush.xpose.msk.msra.mxu1 %vm74_vm2, %v23_v0  ;;  %s230_s28 = sshll.u32 %s360_s3, 4  ;;  %s232_s8 = sshll.u32 %s495_s5, 4  ;;  %vm154_vm10 = vcmask 0   ;;  %v173_v57 = vld [vmem:[%s491_s1] sm:$0xff]  ;;  %v174_v58 = vld [vmem:[%s491_s1 + $0x8] sm:$0xff]  ;;  %v175_v59 = vld [vmem:[%s491_s1 + $0x10] sm:$0xff]  ;;  %s231_s28 = int_to_ptr.vmem [resolvable:$true] %s230_s28  ;;  %s233_s8 = int_to_ptr.hbm [resolvable:$true] %s232_s8 }
   0x5   :  { %s361_s9 = smov [#allocation6]   ;;  %s243_s13 = sshll.u32 %s496_s6, 4  ;;  %v176_v60 = vld [vmem:[%s491_s1 + $0x18] sm:$0xff]  ;;  %v177_v61 = vld [vmem:[%s491_s1 + $0x20] sm:$0xff]  ;;  %v178_v62 = vld [vmem:[%s491_s1 + $0x28] sm:$0xff]  ;;  %vm204_vm15 = vcmask 27648   ;;  %s244_s13 = int_to_ptr.hbm [resolvable:$true] %s243_s13 }
   0x6   :  { %s241_s10 = sshll.u32 %s361_s9, 4  ;;  %s362_s14 = smov [#allocation2]   ;;  %v179_v63 = vld [vmem:[%s491_s1 + $0x30] sm:$0xff]  ;;  %v180_v1 = vld [vmem:[%s491_s1 + $0x38] sm:$0xff]  ;;  %s242_s10 = int_to_ptr.vmem [resolvable:$true] %s241_s10 }
   0x7   :  { %s219_s15 = sshll.u32 %s362_s14, 4  ;;  %s221_s18 = sshll.u32 %s494_s4, 4  ;;  %s220_s15 = int_to_ptr.vmem [resolvable:$true] %s219_s15  ;;  %s222_s18 = int_to_ptr.hbm [resolvable:$true] %s221_s18 }
  0x81   :  { %v46_v2 = vpop.f32.mrf.mxu0 }
  0x82   :  { %v49_v3 = vmul.f32 %v46_v2, %v46_v2 }
  0x84   :  { %v51_v4 = vsel %vm50_vm1, %v49_v3, 0.0 }
  0x85   :  { %52 = vadd.xlane.f32.xlu0 %v51_v4 }
  0xf8   :  { %v53_v5 = vpop.xlane.xlu0 %52 }
  0xf9   :  { %v54_v6 = vrot.slane %v53_v5, 4 }
  0xfb   :  { %v55_v7 = vadd.f32 %v54_v6, %v53_v5  ;;  %v181_v6 = vld [vmem:[%s491_s1 + $0x40] sm:$0xff] }
  0xfd   :  { %v56_v8 = vrot.slane %v55_v7, 2 }
  0xff   :  { %v57_v9 = vadd.f32 %v56_v8, %v55_v7 }
 0x101   :  { %v58_v10 = vrot.slane %v57_v9, 1 }
 0x103   :  { %v59_v11 = vadd.f32 %v58_v10, %v57_v9 }
 0x105   :  { %269 = vpush %v59_v11 }
 0x136   :  { %s270_s0 = spop %269 }
 0x137   :  { %v61_v12 = vstv %s270_s0 }
 0x138   :  { %v62_v13 = vadd.f32 1e-24, %v61_v12 }
 0x13a   :  { %278 = vrsqrt.f32 %v62_v13  ;;  %vm69_vm4 = vweird.f32 %v62_v13 }
 0x140   :  { %v279_v14 = vpop.eup %278 }
 0x141   :  { %v64_v15 = vmul.f32 %v279_v14, %v62_v13  ;;  %vm70_vm3 = vweird.f32 %v279_v14 }
 0x142   :  { %vm71_vm5 = vmor %vm69_vm4, %vm70_vm3 }
 0x143   :  { %v65_v16 = vmul.f32 %v279_v14, %v64_v15 }
 0x145   :  { %v66_v17 = vmul.f32 0.5, %v65_v16 }
 0x147   :  { %v67_v18 = vsub.f32 1.5, %v66_v17 }
 0x149   :  { %v68_v19 = vmul.f32 %v279_v14, %v67_v18 }
 0x14b   :  { %v72_v20 = vsel %vm71_vm5, %v279_v14, %v68_v19 }
 0x14c   :  { %v73_v21 = vmul.f32 %v72_v20, %v46_v2 }
 0x14e   :  { %267 = vmatmul.msk.f32.vlgmr.msra.gmra.mxu1 %vm74_vm2, %v73_v21  ;;  %157 = vst.msk [vmem:[#allocation6] sm:$0x1] %vm50_vm1, %v73_v21  ;;  %v126_v22 = vperm.slane %v73_v21, 0 }
 0x150   :  { %v127_v23 = vmul.f32 %v126_v22, %v23_v0 }
 0x152   :  { %v128_v24 = vsel %vm74_vm2, %v127_v23, 0.0 }
 0x153   :  { %129 = vadd.xlane.f32.xlu1 %v128_v24 }
 0x1c6   :  { %v130_v25 = vpop.xlane.xlu1 %129 }
 0x1c7   :  { %149 = vmatpush.msra.mxu2 %v130_v25 }
 0x1cb   :  { %v98_v26 = vpop.f32.mrf.mxu1 }
 0x1cc   :  { %v101_v27 = vmul.f32 %v98_v26, %v98_v26 }
 0x1ce   :  { %v103_v28 = vsel %vm102_vm6, %v101_v27, 0.0 }
 0x1cf   :  { %104 = vadd.xlane.f32.xlu0 %v103_v28 }
 0x242   :  { %v105_v29 = vpop.xlane.xlu0 %104 }
 0x243   :  { %v106_v30 = vrot.slane %v105_v29, 4 }
 0x245   :  { %v107_v31 = vadd.f32 %v106_v30, %v105_v29 }
 0x247   :  { %v108_v32 = vrot.slane %v107_v31, 2 }
 0x249   :  { %v109_v33 = vadd.f32 %v108_v32, %v107_v31 }
 0x24b   :  { %v110_v34 = vrot.slane %v109_v33, 1 }
 0x24d   :  { %v111_v35 = vadd.f32 %v110_v34, %v109_v33 }
 0x24f   :  { %271 = vpush %v111_v35 }
 0x280   :  { %s272_s2 = spop %271 }
 0x281   :  { %v113_v36 = vstv %s272_s2 }
 0x282   :  { %v114_v37 = vadd.f32 1e-24, %v113_v36 }
 0x284   :  { %280 = vrsqrt.f32 %v114_v37  ;;  %vm121_vm8 = vweird.f32 %v114_v37 }
 0x28a   :  { %v281_v38 = vpop.eup %280 }
 0x28b   :  { %v116_v39 = vmul.f32 %v281_v38, %v114_v37  ;;  %vm122_vm7 = vweird.f32 %v281_v38 }
 0x28c   :  { %vm123_vm9 = vmor %vm121_vm8, %vm122_vm7 }
 0x28d   :  { %v117_v40 = vmul.f32 %v281_v38, %v116_v39 }
 0x28f   :  { %v118_v41 = vmul.f32 0.5, %v117_v40 }
 0x291   :  { %v119_v42 = vsub.f32 1.5, %v118_v41 }
 0x293   :  { %v120_v43 = vmul.f32 %v281_v38, %v119_v42 }
 0x295   :  { %v124_v44 = vsel %vm123_vm9, %v281_v38, %v120_v43 }
 0x296   :  { %v125_v45 = vmul.f32 %v124_v44, %v98_v26 }
 0x298   :  { %268 = vmatmul.msk.f32.vlgmr.msra.gmra.mxu2 %vm25_vm0, %v125_v45  ;;  %156 = vst.msk [vmem:[#allocation4] sm:$0x1] %vm102_vm6, %v125_v45 }
 0x299   :  { %235 = dma.vmem_to_hbm [thread:$0]  %s231_s28, 16, %s233_s8, [#allocation5]  }
 0x29a   :  { %246 = dma.vmem_to_hbm [thread:$0]  %s242_s10, 16, %s244_s13, [#allocation5]  }
 0x31b   :  { %v151_v46 = vpop.f32.mrf.mxu2 }
 0x31c   :  { %282 = vrcp.f32 %v151_v46  ;;  %155 = vst.msk [vmem:[#allocation2] sm:$0x1] %vm154_vm10, %v151_v46  ;;  %v169_v50 = vand.u32 2147483648, %v151_v46  ;;  %v167_v52 = vand.u32 2147483647, %v151_v46  ;;  %vm163_vm12 = vweird.f32 %v151_v46 }
 0x31d   :  { %224 = dma.vmem_to_hbm [thread:$0]  %s220_s15, 16, %s222_s18, [#allocation3]  }
 0x31e   :  { %v170_v54 = vor.u32 1.1754944e-38, %v169_v50  ;;  %vm168_vm14 = vcmp.eq.f32.partialorder %v167_v52, 8.507059e+37 }
 0x322   :  { %v283_v47 = vpop.eup %282 }
 0x323   :  { %v159_v48 = vmul.f32 %v283_v47, %v151_v46  ;;  %vm164_vm11 = vweird.f32 %v283_v47 }
 0x324   :  { %vm165_vm13 = vmor %vm163_vm12, %vm164_vm11 }
 0x325   :  { %v160_v49 = vsub.f32 1.0, %v159_v48 }
 0x327   :  { %v161_v51 = vmul.f32 %v283_v47, %v160_v49 }
 0x329   :  { %v162_v53 = vadd.f32 %v283_v47, %v161_v51 }
 0x32b   :  { %v166_v55 = vsel %vm165_vm13, %v283_v47, %v162_v53 }
 0x32c   :  { %v171_v56 = vsel %vm168_vm14, %v170_v54, %v166_v55 }
 0x32d   :  { %273 = vpush %v171_v56 }
 0x35e   :  { %s274_s0 = spop %273 }
 0x35f   :  { %v184_v0 = vstv %s274_s0 }
 0x360   :  { %v186_v2 = vmul.f32 %v184_v0, %v173_v57  ;;  %v187_v3 = vmul.f32 %v184_v0, %v174_v58  ;;  %v188_v4 = vmul.f32 %v184_v0, %v175_v59  ;;  %v189_v5 = vmul.f32 %v184_v0, %v176_v60 }
 0x361   :  { %v190_v7 = vmul.f32 %v184_v0, %v177_v61  ;;  %v191_v8 = vmul.f32 %v184_v0, %v178_v62  ;;  %v192_v9 = vmul.f32 %v184_v0, %v179_v63  ;;  %v193_v13 = vmul.f32 %v184_v0, %v180_v1 }
 0x362   :  { %v195_v10 = vpack.c.bf16 %v186_v2, %v186_v2  ;;  %v196_v11 = vpack.c.bf16 %v187_v3, %v187_v3  ;;  %v197_v12 = vpack.c.bf16 %v188_v4, %v188_v4  ;;  %v198_v14 = vpack.c.bf16 %v189_v5, %v189_v5 }
 0x363   :  { %v194_v15 = vmul.f32 %v184_v0, %v181_v6  ;;  %v199_v16 = vpack.c.bf16 %v190_v7, %v190_v7  ;;  %v200_v17 = vpack.c.bf16 %v191_v8, %v191_v8  ;;  %v201_v18 = vpack.c.bf16 %v192_v9, %v192_v9 }
 0x364   :  { %205 = vst.msk [vmem:[%s497_s7] sm:$0xf] %vm204_vm15, %v195_v10  ;;  %v202_v19 = vpack.c.bf16 %v193_v13, %v193_v13 }
 0x365   :  { %206 = vst.msk [vmem:[%s497_s7 + $0x4] sm:$0xf] %vm204_vm15, %v196_v11  ;;  %v203_v20 = vpack.c.bf16 %v194_v15, %v194_v15 }
 0x366   :  { %207 = vst.msk [vmem:[%s497_s7 + $0x8] sm:$0xf] %vm204_vm15, %v197_v12 }
 0x367   :  { %208 = vst.msk [vmem:[%s497_s7 + $0xc] sm:$0xf] %vm204_vm15, %v198_v14 }
 0x368   :  { %209 = vst.msk [vmem:[%s497_s7 + $0x10] sm:$0xf] %vm204_vm15, %v199_v16 }
 0x369   :  { %210 = vst.msk [vmem:[%s497_s7 + $0x14] sm:$0xf] %vm204_vm15, %v200_v17 }
 0x36a   :  { %211 = vst.msk [vmem:[%s497_s7 + $0x18] sm:$0xf] %vm204_vm15, %v201_v18 }
 0x36b   :  { %212 = vst.msk [vmem:[%s497_s7 + $0x1c] sm:$0xf] %vm204_vm15, %v202_v19 }
 0x36c   :  { %213 = vst.msk [vmem:[%s497_s7 + $0x20] sm:$0xf] %vm204_vm15, %v203_v20 }
 0x36d   :  { %356 = dma.done.wait [#allocation3], 16  }
 0x36e   :  { %357 = vsyncadd [#allocation3], 4294967280 }
 0x36f   :  { %358 = dma.done.wait [#allocation5], 32  }
 0x370   :  { %359 = vsyncadd [#allocation5], 4294967264 }
 0x371   :  { %263 = vsyncpa [#allocation3], 1 }
 0x372   :  { %264 = vsyncpa [#allocation5], 1 }

</bundles_post_ra>
